<compile_context>
chip_gen: v6e
topology: v6e:2x2x1
jax: 0.10.0
libtpu: 0.0.40
codegen_flags: <defaults>
</compile_context>

<pallas_src>
import functools

import jax
import jax.numpy as jnp
from jax.experimental import pallas as pl
from jax.experimental.pallas import tpu as pltpu

# Module hyperparameters (from the PyTorch source)
K = 3          # kernel size
M = 32         # in channels
N = 32         # out channels
DIL = 6        # dilation
STRIDE = 1
PAD = 0


def _conv_kernel(x_ref, w_ref, b_ref, o_ref, col_ref, *, h_out, w_out):
    """One grid step = one batch element: fused im2col + one deep MXU matmul.

    x_ref:   (1, H, W*M)             one batch element, channels on lanes
    w_ref:   (K*K*w_out*M, w_out*N)  block-diagonal-expanded weights (resident)
    b_ref:   (1, w_out*N)            bias tiled across the w_out lane groups
    o_ref:   (1, h_out, w_out*N)     lane-dense output (w_out*N = 128 lanes)
    col_ref: (h_out, K*K*w_out*M)    im2col slab scratch (VMEM)
    """
    wm = w_out * M
    # Each dilated tap is a contiguous lane window of the (H, W*M) view and is
    # stored into a full 128-lane-aligned column block of the slab: no
    # reshapes, no sublane repacks.  (The kh*DIL / kw*DIL*M misaligned starts
    # cost a cheap XLU rotate per tap; they sit under DMA/overhead slack, so
    # deliberately left as-is per review.)
    for kh in range(K):
        for kw in range(K):
            t = kh * K + kw
            patch = x_ref[:, kh * DIL: kh * DIL + h_out,
                          kw * DIL * M: kw * DIL * M + wm][0]   # (h_out, wm)
            col_ref[:, t * wm:(t + 1) * wm] = patch

    # One deep matmul (reduction depth K*K*w_out*M = 1152), f32 MXU accumulate.
    acc = jnp.dot(col_ref[...], w_ref[...], preferred_element_type=jnp.float32)

    # Full-lane-width bias add + dense store.
    o_ref[0] = (acc + b_ref[...]).astype(o_ref.dtype)


def prepare_params(weight, bias, w_out):
    """One-off parameter preprocessing — do NOT call per forward.

    Expands (N, M, K, K) weights into a block-diagonal (K*K*w_out*M, w_out*N)
    matrix so a single in-kernel matmul emits the output already lane-dense as
    (h, w_out*N).  Dense storage is w_out**2 times the logical weight bytes
    (576 KiB vs 36 KiB at w_out=4); use a plain (K*K*M, N) weight instead once
    w_out grows past ~8-16.
    """
    w_kkmn = jnp.transpose(weight, (2, 3, 1, 0))                 # (K, K, M, N)
    eye = jnp.eye(w_out, dtype=weight.dtype)
    # w_big[((kh*K+kw)*w_out + wo)*M + m, wo*N + n] = w[kh, kw, m, n]
    w_big = jnp.einsum("uv,abmn->abumvn", eye, w_kkmn).reshape(
        K * K * w_out * M, w_out * N)
    # Bias replicated across the w_out lane groups: lane index = wo*N + n.
    b_big = jnp.tile(bias, w_out).reshape(1, w_out * N)
    return w_big, b_big


@jax.jit
def dilated_conv2d(x_nchw, w_big, b_big):
    """Forward pass of SimpleCNN (single fused dispatch under jit).

    x_nchw: (B, M, H, W) float32
    w_big:  (K*K*w_out*M, w_out*N) float32, from prepare_params
    b_big:  (1, w_out*N)           float32, from prepare_params
    returns (B, N, H_out, W_out) float32
    """
    B, Cin, H, W = x_nchw.shape
    assert Cin == M
    h_out = (H + 2 * PAD - DIL * (K - 1) - 1) // STRIDE + 1
    w_out = (W + 2 * PAD - DIL * (K - 1) - 1) // STRIDE + 1
    assert h_out > 0 and w_out > 0
    assert w_big.shape == (K * K * w_out * M, w_out * N), w_big.shape
    assert b_big.shape == (1, w_out * N), b_big.shape

    # NCHW -> NHWC -> (B, H, W*M): channels on lanes, W folded into lanes so
    # every dilated tap is a contiguous lane window inside the kernel.
    x_flat = jnp.transpose(x_nchw, (0, 2, 3, 1)).reshape(B, H, W * M)

    kernel = functools.partial(_conv_kernel, h_out=h_out, w_out=w_out)

    out_flat = pl.pallas_call(
        kernel,
        out_shape=jax.ShapeDtypeStruct((B, h_out, w_out * N), jnp.float32),
        grid_spec=pltpu.PrefetchScalarGridSpec(
            num_scalar_prefetch=0,
            grid=(B,),  # one batch element per step; megacore-sharded on v7x
            in_specs=[
                pl.BlockSpec((1, H, W * M), lambda b: (b, 0, 0)),
                # Constant index_map: weight DMA'd once, resident afterwards.
                pl.BlockSpec((K * K * w_out * M, w_out * N), lambda b: (0, 0)),
                pl.BlockSpec((1, w_out * N), lambda b: (0, 0)),
            ],
            out_specs=pl.BlockSpec((1, h_out, w_out * N), lambda b: (b, 0, 0)),
            scratch_shapes=[
                pltpu.VMEM((h_out, K * K * w_out * M), jnp.float32)],
        ),
        compiler_params=pltpu.CompilerParams(
            dimension_semantics=("parallel",)),
    )(x_flat, w_big, b_big)

    # (B, h_out, w_out*N) -> (B, h_out, w_out, N) is a free metadata reshape;
    # the final transpose to NCHW is a real (tiny) XLA copy, kept only to match
    # the PyTorch module's output layout.  NHWC consumers should instead return
    # out_flat.reshape(B, h_out, w_out, N) directly and skip the transpose.
    out = out_flat.reshape(B, h_out, w_out, N)
    return jnp.transpose(out, (0, 3, 1, 2))


def init_params(key):
    # Deterministic init mimicking PyTorch Conv2d default (uniform +/- 1/sqrt(fan_in)).
    k_w, k_b = jax.random.split(key)
    fan_in = M * K * K
    bound = 1.0 / jnp.sqrt(jnp.float32(fan_in))
    weight = jax.random.uniform(k_w, (N, M, K, K), jnp.float32, -bound, bound)
    bias = jax.random.uniform(k_b, (N,), jnp.float32, -bound, bound)
    return weight, bias


if __name__ == "__main__":
    key = jax.random.PRNGKey(0)
    k_x, k_p = jax.random.split(key)

    # Small input consistent with the module: batch=2, channels=M=32, spatial=16.
    # Spatial must be >= dilation*(K-1)+1 = 13 for a valid (padding=0) conv.
    B, H, W = 2, 16, 16
    x = jax.random.normal(k_x, (B, M, H, W), jnp.float32)
    weight, bias = init_params(k_p)

    # One-off parameter preprocessing, hoisted out of the forward pass.
    w_out = (W + 2 * PAD - DIL * (K - 1) - 1) // STRIDE + 1
    w_big, b_big = jax.block_until_ready(prepare_params(weight, bias, w_out))

    out = dilated_conv2d(x, w_big, b_big)
    out = jax.block_until_ready(out)

    # Correctness check against XLA's dilated convolution.
    ref = jax.lax.conv_general_dilated(
        x, weight,
        window_strides=(STRIDE, STRIDE),
        padding=((PAD, PAD), (PAD, PAD)),
        rhs_dilation=(DIL, DIL),
        dimension_numbers=("NCHW", "OIHW", "NCHW"),
    ) + bias.reshape(1, N, 1, 1)
    ref = jax.block_until_ready(ref)

    assert out.shape == (B, N, H - DIL * (K - 1), W - DIL * (K - 1)), out.shape
    assert jnp.allclose(out, ref, atol=1e-4, rtol=1e-4), \
        float(jnp.max(jnp.abs(out - ref)))
    print("KERNEL_OK")
</pallas_src>

<mosaic_0001>
module attributes {stable_mosaic.version = 11 : i64} {
  func.func @_conv_kernel(%arg0: i32, %arg1: memref<1x16x512xf32, #tpu.memory_space<vmem>>, %arg2: memref<1152x128xf32, #tpu.memory_space<vmem>>, %arg3: memref<1x128xf32, #tpu.memory_space<vmem>>, %arg4: memref<1x4x128xf32, #tpu.memory_space<vmem>>, %arg5: memref<4x1152xf32, #tpu.memory_space<vmem>>) attributes {dimension_semantics = [#tpu.dimension_semantics<parallel>], iteration_bounds = array<i64: 2>, scalar_prefetch = 0 : i64, scratch_operands = 1 : i64, tpu.core_type = #tpu.core_type<tc>, window_params = [{transform_indices = @transform_0, window_bounds = array<i64: 1, 16, 512>}, {pipeline_mode = #tpu.pipeline_mode<synchronous>, transform_indices = @transform_1, window_bounds = array<i64: 1152, 128>}, {pipeline_mode = #tpu.pipeline_mode<synchronous>, transform_indices = @transform_2, window_bounds = array<i64: 1, 128>}, {transform_indices = @transform_3, window_bounds = array<i64: 1, 4, 128>}]} {
    %c0 = arith.constant 0 : index
    %c0_0 = arith.constant 0 : index
    %c0_1 = arith.constant 0 : index
    %0 = vector.load %arg1[%c0, %c0_0, %c0_1] : memref<1x16x512xf32, #tpu.memory_space<vmem>>, vector<1x4x128xf32>
    %1 = vector.shape_cast %0 : vector<1x4x128xf32> to vector<4x128xf32>
    %c0_2 = arith.constant 0 : index
    %c0_3 = arith.constant 0 : index
    %2 = vector.load %arg5[%c0_2, %c0_3] : memref<4x1152xf32, #tpu.memory_space<vmem>>, vector<4x128xf32>
    tpu.vector_store %arg5[%c0_2, %c0_3], %1 {strides = array<i32>} : memref<4x1152xf32, #tpu.memory_space<vmem>>, vector<4x128xf32>,
    %c0_4 = arith.constant 0 : index
    %c0_5 = arith.constant 0 : index
    %c192 = arith.constant 192 : index
    %3 = vector.load %arg1[%c0_4, %c0_5, %c192] : memref<1x16x512xf32, #tpu.memory_space<vmem>>, vector<1x4x128xf32>
    %4 = vector.shape_cast %3 : vector<1x4x128xf32> to vector<4x128xf32>
    %c0_6 = arith.constant 0 : index
    %c128 = arith.constant 128 : index
    %5 = vector.load %arg5[%c0_6, %c128] : memref<4x1152xf32, #tpu.memory_space<vmem>>, vector<4x128xf32>
    tpu.vector_store %arg5[%c0_6, %c128], %4 {strides = array<i32>} : memref<4x1152xf32, #tpu.memory_space<vmem>>, vector<4x128xf32>,
    %c0_7 = arith.constant 0 : index
    %c0_8 = arith.constant 0 : index
    %c384 = arith.constant 384 : index
    %6 = vector.load %arg1[%c0_7, %c0_8, %c384] : memref<1x16x512xf32, #tpu.memory_space<vmem>>, vector<1x4x128xf32>
    %7 = vector.shape_cast %6 : vector<1x4x128xf32> to vector<4x128xf32>
    %c0_9 = arith.constant 0 : index
    %c256 = arith.constant 256 : index
    %8 = vector.load %arg5[%c0_9, %c256] : memref<4x1152xf32, #tpu.memory_space<vmem>>, vector<4x128xf32>
    tpu.vector_store %arg5[%c0_9, %c256], %7 {strides = array<i32>} : memref<4x1152xf32, #tpu.memory_space<vmem>>, vector<4x128xf32>,
    %c0_10 = arith.constant 0 : index
    %c6 = arith.constant 6 : index
    %c0_11 = arith.constant 0 : index
    %9 = vector.load %arg1[%c0_10, %c6, %c0_11] : memref<1x16x512xf32, #tpu.memory_space<vmem>>, vector<1x4x128xf32>
    %10 = vector.shape_cast %9 : vector<1x4x128xf32> to vector<4x128xf32>
    %c0_12 = arith.constant 0 : index
    %c384_13 = arith.constant 384 : index
    %11 = vector.load %arg5[%c0_12, %c384_13] : memref<4x1152xf32, #tpu.memory_space<vmem>>, vector<4x128xf32>
    tpu.vector_store %arg5[%c0_12, %c384_13], %10 {strides = array<i32>} : memref<4x1152xf32, #tpu.memory_space<vmem>>, vector<4x128xf32>,
    %c0_14 = arith.constant 0 : index
    %c6_15 = arith.constant 6 : index
    %c192_16 = arith.constant 192 : index
    %12 = vector.load %arg1[%c0_14, %c6_15, %c192_16] : memref<1x16x512xf32, #tpu.memory_space<vmem>>, vector<1x4x128xf32>
    %13 = vector.shape_cast %12 : vector<1x4x128xf32> to vector<4x128xf32>
    %c0_17 = arith.constant 0 : index
    %c512 = arith.constant 512 : index
    %14 = vector.load %arg5[%c0_17, %c512] : memref<4x1152xf32, #tpu.memory_space<vmem>>, vector<4x128xf32>
    tpu.vector_store %arg5[%c0_17, %c512], %13 {strides = array<i32>} : memref<4x1152xf32, #tpu.memory_space<vmem>>, vector<4x128xf32>,
    %c0_18 = arith.constant 0 : index
    %c6_19 = arith.constant 6 : index
    %c384_20 = arith.constant 384 : index
    %15 = vector.load %arg1[%c0_18, %c6_19, %c384_20] : memref<1x16x512xf32, #tpu.memory_space<vmem>>, vector<1x4x128xf32>
    %16 = vector.shape_cast %15 : vector<1x4x128xf32> to vector<4x128xf32>
    %c0_21 = arith.constant 0 : index
    %c640 = arith.constant 640 : index
    %17 = vector.load %arg5[%c0_21, %c640] : memref<4x1152xf32, #tpu.memory_space<vmem>>, vector<4x128xf32>
    tpu.vector_store %arg5[%c0_21, %c640], %16 {strides = array<i32>} : memref<4x1152xf32, #tpu.memory_space<vmem>>, vector<4x128xf32>,
    %c0_22 = arith.constant 0 : index
    %c12 = arith.constant 12 : index
    %c0_23 = arith.constant 0 : index
    %18 = vector.load %arg1[%c0_22, %c12, %c0_23] : memref<1x16x512xf32, #tpu.memory_space<vmem>>, vector<1x4x128xf32>
    %19 = vector.shape_cast %18 : vector<1x4x128xf32> to vector<4x128xf32>
    %c0_24 = arith.constant 0 : index
    %c768 = arith.constant 768 : index
    %20 = vector.load %arg5[%c0_24, %c768] : memref<4x1152xf32, #tpu.memory_space<vmem>>, vector<4x128xf32>
    tpu.vector_store %arg5[%c0_24, %c768], %19 {strides = array<i32>} : memref<4x1152xf32, #tpu.memory_space<vmem>>, vector<4x128xf32>,
    %c0_25 = arith.constant 0 : index
    %c12_26 = arith.constant 12 : index
    %c192_27 = arith.constant 192 : index
    %21 = vector.load %arg1[%c0_25, %c12_26, %c192_27] : memref<1x16x512xf32, #tpu.memory_space<vmem>>, vector<1x4x128xf32>
    %22 = vector.shape_cast %21 : vector<1x4x128xf32> to vector<4x128xf32>
    %c0_28 = arith.constant 0 : index
    %c896 = arith.constant 896 : index
    %23 = vector.load %arg5[%c0_28, %c896] : memref<4x1152xf32, #tpu.memory_space<vmem>>, vector<4x128xf32>
    tpu.vector_store %arg5[%c0_28, %c896], %22 {strides = array<i32>} : memref<4x1152xf32, #tpu.memory_space<vmem>>, vector<4x128xf32>,
    %c0_29 = arith.constant 0 : index
    %c12_30 = arith.constant 12 : index
    %c384_31 = arith.constant 384 : index
    %24 = vector.load %arg1[%c0_29, %c12_30, %c384_31] : memref<1x16x512xf32, #tpu.memory_space<vmem>>, vector<1x4x128xf32>
    %25 = vector.shape_cast %24 : vector<1x4x128xf32> to vector<4x128xf32>
    %c0_32 = arith.constant 0 : index
    %c1024 = arith.constant 1024 : index
    %26 = vector.load %arg5[%c0_32, %c1024] : memref<4x1152xf32, #tpu.memory_space<vmem>>, vector<4x128xf32>
    tpu.vector_store %arg5[%c0_32, %c1024], %25 {strides = array<i32>} : memref<4x1152xf32, #tpu.memory_space<vmem>>, vector<4x128xf32>,
    %c0_33 = arith.constant 0 : index
    %c0_34 = arith.constant 0 : index
    %27 = vector.load %arg5[%c0_33, %c0_34] : memref<4x1152xf32, #tpu.memory_space<vmem>>, vector<4x1152xf32>
    %c0_35 = arith.constant 0 : index
    %c0_36 = arith.constant 0 : index
    %28 = vector.load %arg2[%c0_35, %c0_36] : memref<1152x128xf32, #tpu.memory_space<vmem>>, vector<1152x128xf32>
    %cst = arith.constant dense<0.000000e+00> : vector<4x128xf32>
    %29 = tpu.matmul %27, %28, %cst {dimension_numbers = #tpu.dot_dimension_numbers<[1], [0], [0], [1], [0, 0, 1, 1], [], []>} : vector<4x1152xf32>, vector<1152x128xf32>, vector<4x128xf32> -> vector<4x128xf32>
    %c0_37 = arith.constant 0 : index
    %c0_38 = arith.constant 0 : index
    %30 = vector.load %arg3[%c0_37, %c0_38] : memref<1x128xf32, #tpu.memory_space<vmem>>, vector<1x128xf32>
    %31 = vector.broadcast %30 : vector<1x128xf32> to vector<4x128xf32>
    %32 = arith.addf %29, %31 : vector<4x128xf32>
    %c0_39 = arith.constant 0 : index
    %c0_40 = arith.constant 0 : index
    %c0_41 = arith.constant 0 : index
    %33 = vector.load %arg4[%c0_39, %c0_40, %c0_41] : memref<1x4x128xf32, #tpu.memory_space<vmem>>, vector<1x4x128xf32>
    %34 = vector.shape_cast %33 : vector<1x4x128xf32> to vector<4x128xf32>
    %35 = vector.shape_cast %32 : vector<4x128xf32> to vector<1x4x128xf32>
    tpu.vector_store %arg4[%c0_39, %c0_40, %c0_41], %35 {strides = array<i32>} : memref<1x4x128xf32, #tpu.memory_space<vmem>>, vector<1x4x128xf32>,
    return
  }
  func.func @transform_0(%arg0: i32) -> (i32, i32, i32) {
    %c0_i32 = arith.constant 0 : i32
    %c0_i32_0 = arith.constant 0 : i32
    %c0_i32_1 = arith.constant 0 : i32
    return %arg0, %c0_i32, %c0_i32_0 : i32, i32, i32
  }
  func.func @transform_1(%arg0: i32) -> (i32, i32) {
    %c0_i32 = arith.constant 0 : i32
    %c0_i32_0 = arith.constant 0 : i32
    %c0_i32_1 = arith.constant 0 : i32
    return %c0_i32, %c0_i32_0 : i32, i32
  }
  func.func @transform_2(%arg0: i32) -> (i32, i32) {
    %c0_i32 = arith.constant 0 : i32
    %c0_i32_0 = arith.constant 0 : i32
    %c0_i32_1 = arith.constant 0 : i32
    return %c0_i32, %c0_i32_0 : i32, i32
  }
  func.func @transform_3(%arg0: i32) -> (i32, i32, i32) {
    %c0_i32 = arith.constant 0 : i32
    %c0_i32_0 = arith.constant 0 : i32
    %c0_i32_1 = arith.constant 0 : i32
    return %arg0, %c0_i32, %c0_i32_0 : i32, i32, i32
  }
}

</mosaic_0001>

<bundles_post_ra>
// kernel: dilated_conv2d.1
= control target key start
LH: loop header
LB: loop body
LE: loop exit
PB: predicated region body
PF: predicated region fallthrough
CT: control target
= control target key end

     0   :  { %8 = vsyncpa [#allocation4], 0  ;;  %s1159_s12 = smov 0   ;;  %s1221_s0 = inlined_call_operand.vmem [shape: f32[2,16,512], index: 0, kind: input, shape index: {}]   ;;  %s1222_s1 = inlined_call_operand.hbm [shape: f32[1152,128], index: 1, kind: input, shape index: {}]   ;;  %s1223_s2 = inlined_call_operand.vmem [shape: f32[1,128], index: 2, kind: input, shape index: {}]   ;;  %s1224_s3 = inlined_call_operand.vmem [shape: f32[2,4,128], index: 3, kind: output, shape index: {}]  }
   0x1 LB: > { %s850_s13 = sadd.s32 4294967295, %s1131_s12   ;;  %p852_p0 = scmp.ge.s32.totalorder %s1131_s12, 1  ;;  %s1131_s12 = sphi %s1159_s12, %s14_s12  }
   0x2   : > { %p113_p1 = scmp.lt.s32.totalorder %s1131_s12, 3  ;;  %s1133_s14 = smov [#allocation3]  }
   0x3   : > { %s125_s15 = sshll.u32 %s1133_s14, 4  ;;  %p1067_p3 = scmp.eq.s32.totalorder %s850_s13, 0  ;;  %s126_s15 = int_to_ptr.vmem [resolvable:$true] %s125_s15 }
   0x4   : > { %p1167_p2 = pnand %p852_p0, %p113_p1  ;;  %s1106_s17 = scalar_lea.vmem %s126_s15, 18432 }
   0x5   : > { %p1107_p7 = scmp.ne.s32.totalorder %s126_s15, %s1106_s17  ;;  %p1114_p10 = scmp.lt.s32.totalorder %s126_s15, %s126_s15 }
   0x6   : > { %p1063_p4 = pneg %p1167_p2  ;;  %p1115_p11 = scmp.lt.s32.totalorder %s1106_s17, %s1106_s17 }
   0x8   : > { %p1064_p5 = pnand %p1067_p3, %p1063_p4  ;;  %p1116_p12 = por %p1115_p11, %p1114_p10 }
   0xa   : > { %p1097_p6 = pneg %p1064_p5 }
   0xc   : > { %p1109_p8 = pnand %p1107_p7, %p1097_p6 }
   0xe   : > { %p1110_p9 = pneg %p1109_p8 }
  0x10   : > { %p1117_p13 = pnand %p1116_p12, %p1110_p9 }
  0x12   : > { %1120 = shalt.err (!%p1117_p13)
}
  0x13   : > { %s1134_s18 = smov 128   ;;  %s1135_s19 = smov 8  }
  0x14   : > { %1066 = dma.hbm_to_vmem [thread:$0]  (!%p1064_p5), %s1222_s1, 18432, %s126_s15, [#allocation4], %s1134_s18, %s1134_s18, %s1135_s19  }
  0x15   : > { %152 = sbr.rel (%p1167_p2) target bundleno = 422 (0x1a6), region = 32 }
  0x1a   : > { %1126 = dma.done.wait (%p1067_p3), [#allocation4], 18432  }
  0x1b   : > { %1128 = vsyncadd (%p1067_p3), [#allocation4], 4294948864  ;;  %p175_p0 = scmp.lt.s32.totalorder %s850_s13, 1  ;;  %vm205_vm0 = vcmask 1041408   ;;  %vm206_vm1 = vcmask 1045508   ;;  %s1136_s26 = smov 64  }
  0x1c   : > { %vm1194_vm2 = vmor %vm205_vm0, %vm206_vm1  ;;  %v302_v16 = vld [vmem:[#allocation3 + $0xf8] sm:$0xff]  ;;  %v301_v18 = vld [vmem:[#allocation3 + $0xf0] sm:$0xff]  ;;  %vm194_vm3 = vcmask 523264   ;;  %vm1138_vm4 = vmmov 0  }
  0x1d   : > { %s1229_s13 = smov (!%p175_p0, %s850_s13), 1  ;;  %v286_v17 = vld [vmem:[#allocation3 + $0x78] sm:$0xff]  ;;  %867 = vmatprep.subr.mxu0 %v302_v16  ;;  %v285_v20 = vld [vmem:[#allocation3 + $0x70] sm:$0xff]  ;;  %v300_v24 = vld [vmem:[#allocation3 + $0xe8] sm:$0xff] }
  0x1e   : > { %s866_s22 = sshll.u32 %s1229_s13, 6  ;;  %v334_v19 = vld [vmem:[#allocation3 + $0x1f8] sm:$0xff]  ;;  %868 = vmatpush3.msra.mxu0 %v286_v17  ;;  %v333_v25 = vld [vmem:[#allocation3 + $0x1f0] sm:$0xff]  ;;  %v284_v26 = vld [vmem:[#allocation3 + $0x68] sm:$0xff]  ;;  %s859_s29 = sshll.u32 %s1229_s13, 2 }
  0x1f   : > { %s1187_s25 = scalar_lea.vmem %s1221_s0, %s866_s22  ;;  %v318_v23 = vld [vmem:[#allocation3 + $0x178] sm:$0xff]  ;;  %869 = vmatprep.subr.mxu0 %v301_v18  ;;  %902 = vmatprep.subr.mxu1 %v334_v19  ;;  %v317_v27 = vld [vmem:[#allocation3 + $0x170] sm:$0xff]  ;;  %v299_v28 = vld [vmem:[#allocation3 + $0xe0] sm:$0xff]  ;;  %s183_s5 = scalar_lea.vmem %s1224_s3, %s859_s29 }
  0x20   : > { %v1083_v0 = vld [vmem:[%s1187_s25 + $0x8] ss:$8 sps:$4 sm:$0xff]   ;;  %v201_v1 = vld [vmem:[%s1187_s25 + $0x20] sm:$0x3]  ;;  %v235_v6 = vld [vmem:[%s1187_s25 + $0x38] sm:$0x3]  ;;  %870 = vmatpush3.msra.mxu0 %v285_v20  ;;  %903 = vmatpush3.msra.mxu1 %v318_v23 }
  0x21   : > { %191 = vrot.lane.b32.xlu0 %v1083_v0, %s1136_s26  ;;  %v1084_v2 = vld [vmem:[%s1187_s25 + $0x4] ss:$0 sps:$4 sm:$0xcc]   ;;  %v210_v3 = vrot.slane %v201_v1, 6  ;;  %v241_v12 = vrot.slane %v235_v6, 6  ;;  %871 = vmatprep.subr.mxu0 %v300_v24  ;;  %v332_v29 = vld [vmem:[#allocation3 + $0x1e8] sm:$0xff] }
  0x22   : > { %v860_v4 = vrot.slane %v1084_v2, 10  ;;  %v1085_v5 = vld [vmem:[%s1187_s25 + $0xc] ss:$8 sps:$4 sm:$0xcc]   ;;  %v283_v30 = vld [vmem:[#allocation3 + $0x60] sm:$0xff]  ;;  %904 = vmatprep.subr.mxu1 %v333_v25  ;;  %872 = vmatpush3.msra.mxu0 %v284_v26  ;;  %v298_v32 = vld [vmem:[#allocation3 + $0xd8] sm:$0xff] }
  0x23   : > { %v1086_v8 = vld [vmem:[%s1187_s25 + $0x28] ss:$8 sps:$4 sm:$0x33]   ;;  %v1087_v9 = vld [vmem:[%s1187_s25 + $0x1c] ss:$0 sps:$4 sm:$0xcc]   ;;  %905 = vmatpush3.msra.mxu1 %v317_v27  ;;  %873 = vmatprep.subr.mxu0 %v299_v28 }
  0x24   : > { %v211_v10 = vsel %vm1194_vm2, %v860_v4, %v210_v3  ;;  %v861_v11 = vrot.slane %v1085_v5, 10  ;;  %v226_v13 = vrot.slane %v1086_v8, 6  ;;  %v862_v14 = vrot.slane %v1087_v9, 10  ;;  %v1088_v15 = vld [vmem:[%s1187_s25 + $0x2c] ss:$8 sps:$4 sm:$0xff]   ;;  %v331_v33 = vld [vmem:[#allocation3 + $0x1e0] sm:$0xff]  ;;  %906 = vmatprep.subr.mxu1 %v332_v29  ;;  %874 = vmatpush3.msra.mxu0 %v283_v30 }
  0x25   : > { %213 = vst [vmem:[#allocation2 + $0xc] sm:$0xf] %v211_v10  ;;  %255 = vrot.lane.b32.xlu1 %v1088_v15, %s1136_s26  ;;  %v316_v31 = vld [vmem:[#allocation3 + $0x168] sm:$0xff]  ;;  %v282_v34 = vld [vmem:[#allocation3 + $0x58] sm:$0xff]  ;;  %v315_v35 = vld [vmem:[#allocation3 + $0x160] sm:$0xff]  ;;  %875 = vmatprep.subr.mxu0 %v298_v32 }
  0x26   : > { %v227_v21 = vsel %vm1194_vm2, %v861_v11, %v226_v13  ;;  %v242_v22 = vsel %vm1194_vm2, %v862_v14, %v241_v12  ;;  %v297_v36 = vld [vmem:[#allocation3 + $0xd0] sm:$0xff]  ;;  %907 = vmatpush3.msra.mxu1 %v316_v31  ;;  %v330_v37 = vld [vmem:[#allocation3 + $0x1d8] sm:$0xff]  ;;  %876 = vmatpush3.msra.mxu0 %v282_v34  ;;  %v296_v40 = vld [vmem:[#allocation3 + $0xc8] sm:$0xff] }
  0x27   : > { %244 = vst [vmem:[#allocation2 + $0x14] sm:$0xf] %v242_v22  ;;  %228 = vrot.lane.b32.xlu0 %v227_v21, %s1136_s26  ;;  %v281_v38 = vld [vmem:[#allocation3 + $0x50] sm:$0xff]  ;;  %908 = vmatprep.subr.mxu1 %v331_v33  ;;  %v314_v39 = vld [vmem:[#allocation3 + $0x158] sm:$0xff]  ;;  %v280_v42 = vld [vmem:[#allocation3 + $0x48] sm:$0xff] }
  0x28   : > { %909 = vmatpush3.msra.mxu1 %v315_v35  ;;  %877 = vmatprep.subr.mxu0 %v297_v36  ;;  %v329_v41 = vld [vmem:[#allocation3 + $0x1d0] sm:$0xff]  ;;  %v295_v44 = vld [vmem:[#allocation3 + $0xc0] sm:$0xff]  ;;  %v328_v45 = vld [vmem:[#allocation3 + $0x1c8] sm:$0xff] }
  0x29   : > { %910 = vmatprep.subr.mxu1 %v330_v37  ;;  %878 = vmatpush3.msra.mxu0 %v281_v38  ;;  %v313_v43 = vld [vmem:[#allocation3 + $0x150] sm:$0xff]  ;;  %v279_v46 = vld [vmem:[#allocation3 + $0x40] sm:$0xff]  ;;  %v312_v47 = vld [vmem:[#allocation3 + $0x148] sm:$0xff] }
  0x2a   : > { %911 = vmatpush3.msra.mxu1 %v314_v39  ;;  %879 = vmatprep.subr.mxu0 %v296_v40  ;;  %v294_v48 = vld [vmem:[#allocation3 + $0xb8] sm:$0xff]  ;;  %v327_v49 = vld [vmem:[#allocation3 + $0x1c0] sm:$0xff]  ;;  %v293_v52 = vld [vmem:[#allocation3 + $0xb0] sm:$0xff] }
  0x2b   : > { %912 = vmatprep.subr.mxu1 %v329_v41  ;;  %880 = vmatpush3.msra.mxu0 %v280_v42  ;;  %v278_v50 = vld [vmem:[#allocation3 + $0x38] sm:$0xff]  ;;  %v311_v51 = vld [vmem:[#allocation3 + $0x140] sm:$0xff]  ;;  %v277_v54 = vld [vmem:[#allocation3 + $0x30] sm:$0xff] }
  0x2c   : > { %913 = vmatpush3.msra.mxu1 %v313_v43  ;;  %881 = vmatprep.subr.mxu0 %v295_v44  ;;  %v326_v53 = vld [vmem:[#allocation3 + $0x1b8] sm:$0xff]  ;;  %v292_v56 = vld [vmem:[#allocation3 + $0xa8] sm:$0xff]  ;;  %v325_v57 = vld [vmem:[#allocation3 + $0x1b0] sm:$0xff] }
  0x2d   : > { %914 = vmatprep.subr.mxu1 %v328_v45  ;;  %882 = vmatpush3.msra.mxu0 %v279_v46  ;;  %v310_v55 = vld [vmem:[#allocation3 + $0x138] sm:$0xff]  ;;  %v276_v58 = vld [vmem:[#allocation3 + $0x28] sm:$0xff]  ;;  %v309_v59 = vld [vmem:[#allocation3 + $0x130] sm:$0xff] }
  0x2e   : > { %915 = vmatpush3.msra.mxu1 %v312_v47  ;;  %883 = vmatprep.subr.mxu0 %v294_v48  ;;  %v291_v60 = vld [vmem:[#allocation3 + $0xa0] sm:$0xff]  ;;  %v324_v61 = vld [vmem:[#allocation3 + $0x1a8] sm:$0xff]  ;;  %v184_v63 = vld [vmem:[%s1187_s25] sm:$0xf] }
  0x2f   : > { %916 = vmatprep.subr.mxu1 %v327_v49  ;;  %884 = vmatpush3.msra.mxu0 %v278_v50  ;;  %v275_v62 = vld [vmem:[#allocation3 + $0x20] sm:$0xff]  ;;  %v308_v0 = vld [vmem:[#allocation3 + $0x128] sm:$0xff]  ;;  %v290_v1 = vld [vmem:[#allocation3 + $0x98] sm:$0xff]  ;;  %185 = vst [vmem:[#allocation2] sm:$0xf] %v184_v63 }
  0x30   : > { %917 = vmatpush3.msra.mxu1 %v311_v51  ;;  %885 = vmatprep.subr.mxu0 %v293_v52  ;;  %v198_v2 = vld [vmem:[%s1187_s25 + $0x18] sm:$0xf]  ;;  %v323_v3 = vld [vmem:[#allocation3 + $0x1a0] sm:$0xff]  ;;  %v274_v4 = vld [vmem:[#allocation3 + $0x18] sm:$0xff] }
  0x31   : > { %918 = vmatprep.subr.mxu1 %v326_v53  ;;  %886 = vmatpush3.msra.mxu0 %v277_v54  ;;  %199 = vst [vmem:[#allocation2 + $0x8] sm:$0xf] %v198_v2  ;;  %v307_v5 = vld [vmem:[#allocation3 + $0x120] sm:$0xff]  ;;  %v289_v6 = vld [vmem:[#allocation3 + $0x90] sm:$0xff]  ;;  %v322_v7 = vld [vmem:[#allocation3 + $0x198] sm:$0xff] }
  0x32   : > { %919 = vmatpush3.msra.mxu1 %v310_v55  ;;  %887 = vmatprep.subr.mxu0 %v292_v56  ;;  %v273_v8 = vld [vmem:[#allocation3 + $0x10] sm:$0xff]  ;;  %v306_v9 = vld [vmem:[#allocation3 + $0x118] sm:$0xff]  ;;  %v288_v10 = vld [vmem:[#allocation3 + $0x88] sm:$0xff] }
  0x33   : > { %920 = vmatprep.subr.mxu1 %v325_v57  ;;  %888 = vmatpush3.msra.mxu0 %v276_v58  ;;  %v321_v11 = vld [vmem:[#allocation3 + $0x190] sm:$0xff]  ;;  %v272_v12 = vld [vmem:[#allocation3 + $0x8] sm:$0xff]  ;;  %v287_v14 = vld [vmem:[#allocation3 + $0x80] sm:$0xff] }
  0x34   : > { %921 = vmatpush3.msra.mxu1 %v309_v59  ;;  %889 = vmatprep.subr.mxu0 %v291_v60  ;;  %v305_v13 = vld [vmem:[#allocation3 + $0x110] sm:$0xff]  ;;  %v320_v15 = vld [vmem:[#allocation3 + $0x188] sm:$0xff]  ;;  %v271_v16 = vld [vmem:[#allocation3] sm:$0xff] }
  0x35   : > { %922 = vmatprep.subr.mxu1 %v324_v61  ;;  %890 = vmatpush3.msra.mxu0 %v275_v62  ;;  %v304_v17 = vld [vmem:[#allocation3 + $0x108] sm:$0xff]  ;;  %v366_v18 = vld [vmem:[#allocation3 + $0x2f8] sm:$0xff]  ;;  %v319_v20 = vld [vmem:[#allocation3 + $0x180] sm:$0xff] }
  0x36   : > { %923 = vmatpush3.msra.mxu1 %v308_v0  ;;  %891 = vmatprep.subr.mxu0 %v290_v1  ;;  %v303_v22 = vld [vmem:[#allocation3 + $0x100] sm:$0xff]  ;;  %v398_v23 = vld [vmem:[#allocation3 + $0x3f8] sm:$0xff]  ;;  %v397_v25 = vld [vmem:[#allocation3 + $0x3f0] sm:$0xff] }
  0x37   : > { %924 = vmatprep.subr.mxu1 %v323_v3  ;;  %892 = vmatpush3.msra.mxu0 %v274_v4  ;;  %v382_v24 = vld [vmem:[#allocation3 + $0x378] sm:$0xff]  ;;  %v381_v26 = vld [vmem:[#allocation3 + $0x370] sm:$0xff]  ;;  %v396_v27 = vld [vmem:[#allocation3 + $0x3e8] sm:$0xff] }
  0x38   : > { %925 = vmatpush3.msra.mxu1 %v307_v5  ;;  %893 = vmatprep.subr.mxu0 %v289_v6  ;;  %v267_v19 = vld [vmem:[#allocation2 + $0x8] sm:$0xff]  ;;  %v394_v31 = vld [vmem:[#allocation3 + $0x3d8] sm:$0xff]  ;;  %v393_v33 = vld [vmem:[#allocation3 + $0x3d0] sm:$0xff] }
  0x39   : > { %926 = vmatprep.subr.mxu1 %v322_v7  ;;  %894 = vmatpush3.msra.mxu0 %v273_v8  ;;  %v427_v21 = vcombine.high %v267_v19, %v267_v19  ;;  %v380_v28 = vld [vmem:[#allocation3 + $0x368] sm:$0xff]  ;;  %v395_v29 = vld [vmem:[#allocation3 + $0x3e0] sm:$0xff]  ;;  %v378_v32 = vld [vmem:[#allocation3 + $0x358] sm:$0xff] }
  0x3a   : > { %927 = vmatpush3.msra.mxu1 %v306_v9  ;;  %895 = vmatprep.subr.mxu0 %v288_v10  ;;  %v379_v30 = vld [vmem:[#allocation3 + $0x360] sm:$0xff]  ;;  %v377_v34 = vld [vmem:[#allocation3 + $0x350] sm:$0xff]  ;;  %v392_v36 = vld [vmem:[#allocation3 + $0x3c8] sm:$0xff] }
  0x3b   : > { %928 = vmatprep.subr.mxu1 %v321_v11  ;;  %896 = vmatpush3.msra.mxu0 %v272_v12  ;;  %v1092_v35 = vld [vmem:[%s1187_s25 + $0x24] ss:$0 sps:$4 sm:$0xff]   ;;  %v376_v37 = vld [vmem:[#allocation3 + $0x348] sm:$0xff]  ;;  %v390_v40 = vld [vmem:[#allocation3 + $0x3b8] sm:$0xff] }
  0x3c   : > { %929 = vmatpush3.msra.mxu1 %v305_v13  ;;  %897 = vmatprep.subr.mxu0 %v287_v14  ;;  %249 = vst [vmem:[#allocation2 + $0x18] sm:$0xf] %v1092_v35  ;;  %v391_v38 = vld [vmem:[#allocation3 + $0x3c0] sm:$0xff]  ;;  %v374_v41 = vld [vmem:[#allocation3 + $0x338] sm:$0xff]  ;;  %v389_v43 = vld [vmem:[#allocation3 + $0x3b0] sm:$0xff] }
  0x3d   : > { %930 = vmatprep.subr.mxu1 %v320_v15  ;;  %898 = vmatpush3.msra.mxu0 %v271_v16  ;;  %v375_v39 = vld [vmem:[#allocation3 + $0x340] sm:$0xff]  ;;  %v1094_v42 = vld [vmem:[%s1187_s25 + $0x3c] ss:$0 sps:$4 sm:$0xff]   ;;  %v373_v44 = vld [vmem:[#allocation3 + $0x330] sm:$0xff] }
  0x3e   : > { %931 = vmatpush3.msra.mxu1 %v304_v17  ;;  %937 = vmatprep.subr.mxu0 %v366_v18  ;;  %265 = vst [vmem:[#allocation2 + $0x20] sm:$0xf] %v1094_v42  ;;  %v388_v45 = vld [vmem:[#allocation3 + $0x3a8] sm:$0xff]  ;;  %v387_v47 = vld [vmem:[#allocation3 + $0x3a0] sm:$0xff]  ;;  %v386_v49 = vld [vmem:[#allocation3 + $0x398] sm:$0xff] }
  0x3f   : > { %932 = vmatprep.subr.mxu1 %v319_v20  ;;  %568 = vmatprep.mubr.f32.mxu1 %v427_v21  ;;  %v372_v46 = vld [vmem:[#allocation3 + $0x328] sm:$0xff]  ;;  %v371_v48 = vld [vmem:[#allocation3 + $0x320] sm:$0xff]  ;;  %v370_v50 = vld [vmem:[#allocation3 + $0x318] sm:$0xff] }
  0x40   : > { %933 = vmatpush3.msra.mxu1 %v303_v22  ;;  %v385_v51 = vld [vmem:[#allocation3 + $0x390] sm:$0xff]  ;;  %v384_v53 = vld [vmem:[#allocation3 + $0x388] sm:$0xff]  ;;  %v383_v55 = vld [vmem:[#allocation3 + $0x380] sm:$0xff] }
  0x41   : > { %972 = vmatprep.subr.mxu1 %v398_v23  ;;  %569 = vmatmul.mubr.f32.vlgmr.msra.gmra.mxu1 %v267_v19  ;;  %v369_v52 = vld [vmem:[#allocation3 + $0x310] sm:$0xff]  ;;  %v368_v54 = vld [vmem:[#allocation3 + $0x308] sm:$0xff]  ;;  %v367_v56 = vld [vmem:[#allocation3 + $0x300] sm:$0xff] }
  0x42   : > { %973 = vmatpush3.msra.mxu1 %v382_v24  ;;  %v350_v4 = vld [vmem:[#allocation3 + $0x278] sm:$0xff]  ;;  %v365_v5 = vld [vmem:[#allocation3 + $0x2f0] sm:$0xff]  ;;  %v364_v7 = vld [vmem:[#allocation3 + $0x2e8] sm:$0xff] }
  0x43   : > { %974 = vmatprep.subr.mxu1 %v397_v25  ;;  %v349_v6 = vld [vmem:[#allocation3 + $0x270] sm:$0xff]  ;;  %v348_v8 = vld [vmem:[#allocation3 + $0x268] sm:$0xff]  ;;  %v363_v9 = vld [vmem:[#allocation3 + $0x2e0] sm:$0xff] }
  0x44   : > { %975 = vmatpush3.msra.mxu1 %v381_v26  ;;  %v347_v11 = vld [vmem:[#allocation3 + $0x260] sm:$0xff]  ;;  %v362_v14 = vld [vmem:[#allocation3 + $0x2d8] sm:$0xff]  ;;  %v361_v17 = vld [vmem:[#allocation3 + $0x2d0] sm:$0xff] }
  0x45   : > { %976 = vmatprep.subr.mxu1 %v396_v27  ;;  %v346_v16 = vld [vmem:[#allocation3 + $0x258] sm:$0xff]  ;;  %v345_v18 = vld [vmem:[#allocation3 + $0x250] sm:$0xff]  ;;  %v360_v19 = vld [vmem:[#allocation3 + $0x2c8] sm:$0xff] }
  0x46   : > { %977 = vmatpush3.msra.mxu1 %v380_v28  ;;  %v344_v20 = vld [vmem:[#allocation3 + $0x248] sm:$0xff]  ;;  %v359_v21 = vld [vmem:[#allocation3 + $0x2c0] sm:$0xff]  ;;  %v358_v23 = vld [vmem:[#allocation3 + $0x2b8] sm:$0xff] }
  0x47   : > { %978 = vmatprep.subr.mxu1 %v395_v29  ;;  %v343_v22 = vld [vmem:[#allocation3 + $0x240] sm:$0xff]  ;;  %v342_v24 = vld [vmem:[#allocation3 + $0x238] sm:$0xff]  ;;  %v357_v25 = vld [vmem:[#allocation3 + $0x2b0] sm:$0xff] }
  0x48   : > { %979 = vmatpush3.msra.mxu1 %v379_v30  ;;  %v341_v26 = vld [vmem:[#allocation3 + $0x230] sm:$0xff]  ;;  %v356_v27 = vld [vmem:[#allocation3 + $0x2a8] sm:$0xff]  ;;  %v355_v29 = vld [vmem:[#allocation3 + $0x2a0] sm:$0xff] }
  0x49   : > { %980 = vmatprep.subr.mxu1 %v394_v31  ;;  %v340_v28 = vld [vmem:[#allocation3 + $0x228] sm:$0xff]  ;;  %v339_v30 = vld [vmem:[#allocation3 + $0x220] sm:$0xff]  ;;  %v354_v31 = vld [vmem:[#allocation3 + $0x298] sm:$0xff] }
  0x4a   : > { %981 = vmatpush3.msra.mxu1 %v378_v32  ;;  %v338_v32 = vld [vmem:[#allocation3 + $0x218] sm:$0xff]  ;;  %v352_v35 = vld [vmem:[#allocation3 + $0x288] sm:$0xff] }
  0x4b   : > { %982 = vmatprep.subr.mxu1 %v393_v33  ;;  %v353_v33 = vld [vmem:[#allocation3 + $0x290] sm:$0xff]  ;;  %v412_v42 = vld [vmem:[#allocation3 + $0x468] sm:$0xff] }
  0x4c   : > { %983 = vmatpush3.msra.mxu1 %v377_v34  ;;  %v337_v34 = vld [vmem:[#allocation3 + $0x210] sm:$0xff] }
  0x4d   : > { %984 = vmatprep.subr.mxu1 %v392_v36  ;;  %v336_v36 = vld [vmem:[#allocation3 + $0x208] sm:$0xff] }
  0x4e   : > { %985 = vmatpush3.msra.mxu1 %v376_v37  ;;  %v351_v37 = vld [vmem:[#allocation3 + $0x280] sm:$0xff] }
  0x4f   : > { %986 = vmatprep.subr.mxu1 %v391_v38  ;;  %v335_v38 = vld [vmem:[#allocation3 + $0x200] sm:$0xff] }
  0x50   : > { %987 = vmatpush3.msra.mxu1 %v375_v39  ;;  %v414_v39 = vld [vmem:[#allocation3 + $0x478] sm:$0xff] }
  0x51   : > { %988 = vmatprep.subr.mxu1 %v390_v40  ;;  %v1137_v40 = vmov 0.0  }
  0x52   : > { %989 = vmatpush3.msra.mxu1 %v374_v41  ;;  %v413_v41 = vld [vmem:[#allocation3 + $0x470] sm:$0xff] }
  0x53   : > { %990 = vmatprep.subr.mxu1 %v389_v43  ;;  %v411_v43 = vld [vmem:[#allocation3 + $0x460] sm:$0xff] }
  0x54   : > { %991 = vmatpush3.msra.mxu1 %v373_v44  ;;  %v410_v44 = vld [vmem:[#allocation3 + $0x458] sm:$0xff] }
  0x55   : > { %992 = vmatprep.subr.mxu1 %v388_v45  ;;  %v409_v45 = vld [vmem:[#allocation3 + $0x450] sm:$0xff] }
  0x56   : > { %993 = vmatpush3.msra.mxu1 %v372_v46  ;;  %v408_v46 = vld [vmem:[#allocation3 + $0x448] sm:$0xff] }
  0x57   : > { %994 = vmatprep.subr.mxu1 %v387_v47  ;;  %v407_v47 = vld [vmem:[#allocation3 + $0x440] sm:$0xff] }
  0x58   : > { %995 = vmatpush3.msra.mxu1 %v371_v48  ;;  %v406_v48 = vld [vmem:[#allocation3 + $0x438] sm:$0xff] }
  0x59   : > { %996 = vmatprep.subr.mxu1 %v386_v49  ;;  %v405_v49 = vld [vmem:[#allocation3 + $0x430] sm:$0xff] }
  0x5a   : > { %997 = vmatpush3.msra.mxu1 %v370_v50  ;;  %v404_v50 = vld [vmem:[#allocation3 + $0x428] sm:$0xff] }
  0x5b   : > { %998 = vmatprep.subr.mxu1 %v385_v51  ;;  %v403_v51 = vld [vmem:[#allocation3 + $0x420] sm:$0xff] }
  0x5c   : > { %999 = vmatpush3.msra.mxu1 %v369_v52  ;;  %v402_v52 = vld [vmem:[#allocation3 + $0x418] sm:$0xff] }
  0x5d   : > { %1000 = vmatprep.subr.mxu1 %v384_v53  ;;  %v401_v53 = vld [vmem:[#allocation3 + $0x410] sm:$0xff] }
  0x5e   : > { %1001 = vmatpush3.msra.mxu1 %v368_v54  ;;  %v400_v54 = vld [vmem:[#allocation3 + $0x408] sm:$0xff] }
  0x5f   : > { %1002 = vmatprep.subr.mxu1 %v383_v55  ;;  %v399_v55 = vld [vmem:[#allocation3 + $0x400] sm:$0xff] }
  0x60   : > { %1003 = vmatpush3.msra.mxu1 %v367_v56  ;;  %v270_v56 = vld [vmem:[#allocation2 + $0x20] sm:$0xf] }
  0x93   : > { %v192_v57 = vpop.permute.xlu0 %191 }
  0x94   : > { %v193_v58 = vrot.slane %v192_v57, 4 }
  0x96   : > { %v195_v59 = vsel %vm194_vm3, %v192_v57, %v193_v58 }
  0x97   : > { %197 = vst [vmem:[#allocation2 + $0x4] sm:$0xf] %v195_v59  ;;  %v256_v60 = vpop.permute.xlu1 %255 }
  0x98   : > { %v257_v62 = vrot.slane %v256_v60, 4 }
  0x99   : > { %v229_v61 = vpop.permute.xlu0 %228 }
  0x9a   : > { %v230_v63 = vrot.slane %v229_v61, 4  ;;  %v258_v0 = vsel %vm194_vm3, %v256_v60, %v257_v62  ;;  %v863_v62 = vld [vmem:[%s1223_s2] ss:$0 sm:$0xff] }
  0x9b   : > { %260 = vst [vmem:[#allocation2 + $0x1c] sm:$0xf] %v258_v0 }
  0x9c   : > { %v231_v2 = vsel %vm194_vm3, %v229_v61, %v230_v63 }
  0x9d   : > { %233 = vst [vmem:[#allocation2 + $0x10] sm:$0xf] %v231_v2 }
  0x9e   : > { %v266_v1 = vld [vmem:[#allocation2] sm:$0xff] }
  0x9f   : > { %v426_v3 = vcombine.high %v266_v1, %v266_v1 }
  0xa1   : > { %498 = vmatprep.mubr.f32.mxu0 %v426_v3 }
  0xa2   : > { %499 = vmatmul.mubr.f32.vlgmr.msra.gmra.mxu0 %v266_v1  ;;  %v269_v10 = vld [vmem:[#allocation2 + $0x18] sm:$0xff] }
  0xa3   : > { %938 = vmatpush3.msra.mxu0 %v350_v4  ;;  %v429_v13 = vcombine.high %v269_v10, %v269_v10 }
  0xa4   : > { %939 = vmatprep.subr.mxu0 %v365_v5  ;;  %v268_v12 = vld [vmem:[#allocation2 + $0x10] sm:$0xff] }
  0xa5   : > { %940 = vmatpush3.msra.mxu0 %v349_v6  ;;  %v428_v15 = vcombine.high %v268_v12, %v268_v12  ;;  %708 = vmatprep.mubr.f32.mxu1 %v429_v13 }
  0xa6   : > { %941 = vmatprep.subr.mxu0 %v364_v7  ;;  %709 = vmatmul.mubr.f32.vlgmr.msra.gmra.mxu1 %v269_v10 }
  0xa7   : > { %942 = vmatpush3.msra.mxu0 %v348_v8  ;;  %638 = vmatprep.mubr.f32.mxu0 %v428_v15 }
  0xa8   : > { %943 = vmatprep.subr.mxu0 %v363_v9 }
  0xa9   : > { %944 = vmatpush3.msra.mxu0 %v347_v11 }
  0xaa   : > { %945 = vmatprep.subr.mxu0 %v362_v14 }
  0xab   : > { %946 = vmatpush3.msra.mxu0 %v346_v16 }
  0xac   : > { %947 = vmatprep.subr.mxu0 %v361_v17 }
  0xad   : > { %948 = vmatpush3.msra.mxu0 %v345_v18 }
  0xae   : > { %949 = vmatprep.subr.mxu0 %v360_v19 }
  0xaf   : > { %950 = vmatpush3.msra.mxu0 %v344_v20 }
  0xb0   : > { %951 = vmatprep.subr.mxu0 %v359_v21 }
  0xb1   : > { %952 = vmatpush3.msra.mxu0 %v343_v22 }
  0xb2   : > { %953 = vmatprep.subr.mxu0 %v358_v23 }
  0xb3   : > { %954 = vmatpush3.msra.mxu0 %v342_v24 }
  0xb4   : > { %955 = vmatprep.subr.mxu0 %v357_v25 }
  0xb5   : > { %956 = vmatpush3.msra.mxu0 %v341_v26 }
  0xb6   : > { %957 = vmatprep.subr.mxu0 %v356_v27 }
  0xb7   : > { %958 = vmatpush3.msra.mxu0 %v340_v28 }
  0xb8   : > { %959 = vmatprep.subr.mxu0 %v355_v29 }
  0xb9   : > { %960 = vmatpush3.msra.mxu0 %v339_v30 }
  0xba   : > { %961 = vmatprep.subr.mxu0 %v354_v31 }
  0xbb   : > { %962 = vmatpush3.msra.mxu0 %v338_v32 }
  0xbc   : > { %963 = vmatprep.subr.mxu0 %v353_v33 }
  0xbd   : > { %964 = vmatpush3.msra.mxu0 %v337_v34 }
  0xbe   : > { %965 = vmatprep.subr.mxu0 %v352_v35 }
  0xbf   : > { %966 = vmatpush3.msra.mxu0 %v336_v36 }
  0xc0   : > { %967 = vmatprep.subr.mxu0 %v351_v37 }
  0xc1   : > { %968 = vmatpush3.msra.mxu0 %v335_v38 }
  0xc2   : > { %639 = vmatmul.mubr.f32.vlgmr.msra.gmra.mxu0 %v268_v12  ;;  %1024 = vmatprep.subr.mxu0 %v1137_v40 }
  0xc3   : > { %1025 = vmatpush3.msra.mxu0 %v414_v39  ;;  %1056 = vmatprep.mubr.msk.f32.mxu0 %vm1138_vm4, %v1137_v40 }
  0xc4   : > { %1026 = vmatprep.subr.mxu0 %v1137_v40 }
  0xc5   : > { %1027 = vmatpush3.msra.mxu0 %v413_v41 }
  0xc6   : > { %1028 = vmatprep.subr.mxu0 %v1137_v40 }
  0xc7   : > { %1029 = vmatpush3.msra.mxu0 %v412_v42 }
  0xc8   : > { %1030 = vmatprep.subr.mxu0 %v1137_v40 }
  0xc9   : > { %1031 = vmatpush3.msra.mxu0 %v411_v43 }
  0xca   : > { %1032 = vmatprep.subr.mxu0 %v1137_v40 }
  0xcb   : > { %1033 = vmatpush3.msra.mxu0 %v410_v44 }
  0xcc   : > { %1034 = vmatprep.subr.mxu0 %v1137_v40 }
  0xcd   : > { %1035 = vmatpush3.msra.mxu0 %v409_v45 }
  0xce   : > { %1036 = vmatprep.subr.mxu0 %v1137_v40 }
  0xcf   : > { %1037 = vmatpush3.msra.mxu0 %v408_v46 }
  0xd0   : > { %1038 = vmatprep.subr.mxu0 %v1137_v40 }
  0xd1   : > { %1039 = vmatpush3.msra.mxu0 %v407_v47 }
  0xd2   : > { %1040 = vmatprep.subr.mxu0 %v1137_v40 }
  0xd3   : > { %1041 = vmatpush3.msra.mxu0 %v406_v48 }
  0xd4   : > { %1042 = vmatprep.subr.mxu0 %v1137_v40 }
  0xd5   : > { %1043 = vmatpush3.msra.mxu0 %v405_v49 }
  0xd6   : > { %1044 = vmatprep.subr.mxu0 %v1137_v40 }
  0xd7   : > { %1045 = vmatpush3.msra.mxu0 %v404_v50 }
  0xd8   : > { %1046 = vmatprep.subr.mxu0 %v1137_v40 }
  0xd9   : > { %1047 = vmatpush3.msra.mxu0 %v403_v51 }
  0xda   : > { %1048 = vmatprep.subr.mxu0 %v1137_v40 }
  0xdb   : > { %1049 = vmatpush3.msra.mxu0 %v402_v52 }
  0xdc   : > { %1050 = vmatprep.subr.mxu0 %v1137_v40 }
  0xdd   : > { %1051 = vmatpush3.msra.mxu0 %v401_v53 }
  0xde   : > { %1052 = vmatprep.subr.mxu0 %v1137_v40 }
  0xdf   : > { %1053 = vmatpush3.msra.mxu0 %v400_v54 }
  0xe0   : > { %1054 = vmatprep.subr.mxu0 %v1137_v40 }
  0xe1   : > { %1055 = vmatpush3.msra.mxu0 %v399_v55 }
  0xe2   : > { %1057 = vmatmul.mubr.f32.vlgmr.msra.gmra.mxu0 %v270_v56 }
 0x101   : > { %v934_v59 = vpop.f32.mrf.mxu1 }
 0x103   : > { %v935_v63 = vpop.f32.mrf.mxu1 }
 0x104   : > { %v936_v3 = vadd.f32 %v935_v63, %v934_v59 }
 0x162   : > { %v899_v57 = vpop.f32.mrf.mxu0 }
 0x164   : > { %v900_v58 = vpop.f32.mrf.mxu0 }
 0x165   : > { %v901_v61 = vadd.f32 %v900_v58, %v899_v57 }
 0x166   : > { %v1004_v1 = vpop.f32.mrf.mxu1 }
 0x167   : > { %v501_v2 = vadd.f32 %v901_v61, %v863_v62 }
 0x168   : > { %v1005_v5 = vpop.f32.mrf.mxu1 }
 0x169   : > { %v571_v6 = vadd.f32 %v936_v3, %v501_v2  ;;  %v1006_v8 = vadd.f32 %v1005_v5, %v1004_v1 }
 0x182   : > { %v969_v60 = vpop.f32.mrf.mxu0 }
 0x184   : > { %v970_v0 = vpop.f32.mrf.mxu0 }
 0x185   : > { %v971_v4 = vadd.f32 %v970_v0, %v969_v60 }
 0x187   : > { %v641_v7 = vadd.f32 %v971_v4, %v571_v6 }
 0x189   : > { %v711_v9 = vadd.f32 %v1006_v8, %v641_v7 }
 0x1a2   : > { %v780_v10 = vpop.f32.mrf.mxu0 }
 0x1a3   : > { %v781_v11 = vadd.f32 %v780_v10, %v711_v9 }
 0x1a4   : > { %v1058_v12 = vpop.f32.mrf.mxu0 }
 0x1a5   : > { %784 = vst [vmem:[%s183_s5] sm:$0xf] %v781_v11 }
 0x1a6 PF: > { %s14_s12 = sadd.s32 1, %s1131_s12  }
 0x1a7   : > { %p11_p1 = scmp.ge.s32.totalorder %s14_s12, 4  }
 0x1a9   :  { %13 = sbr.rel (!%p11_p1) target bundleno = 1 (0x1), region = 67 }
 0x1ae   :  { %804 = vsyncpa [#allocation4], 1 }
 0x1af   :  { %806 = vsyncpa [#allocation4 + $0x1], 1 }

</bundles_post_ra>
